<compile_context>
chip_gen: v5e
topology: v5e:2x2
jax: 0.10.0
libtpu: 0.0.40
codegen_flags: <defaults>
</compile_context>

<pallas_src>
import functools
import random

import jax
import jax.numpy as jnp
from jax.experimental import pallas as pl
from jax.experimental.pallas import tpu as pltpu


def _round_up(x, m):
    return ((x + m - 1) // m) * m


def sgns_loss_kernel(iv_ref, ctx_ref, out_ref, *, n_valid, n_neg, emb_dim):
    """One row-tile of the SGNS loss.

    iv_ref : (TN, E)             gathered input-word vectors        (bf16/f32)
    ctx_ref: (TN, (n_neg+1)*E)   [oword | neg_0 | ... | neg_{k-1}]  (bf16/f32)
    out_ref: (8, 128) f32        tile partial sum, broadcast over the block
    """
    K = n_neg + 1
    E = emb_dim
    tn = iv_ref.shape[0]

    iv = iv_ref[...].astype(jnp.float32)          # (TN, E)      f32 compute
    ctx = ctx_ref[...].astype(jnp.float32)        # (TN, K*E)

    # Lane-dense multiply: replicate iv across the K context slots along lanes.
    iv_wide = jnp.concatenate([iv] * K, axis=1)   # (TN, K*E)
    prod = iv_wide * ctx                          # (TN, K*E)    VPU

    # Segmented lane reduction -> one score per (row, context slot).
    cols = [
        jnp.sum(prod[:, j * E:(j + 1) * E], axis=1, keepdims=True)   # (TN, 1)
        for j in range(K)
    ]
    scores = jnp.concatenate(cols, axis=1)        # (TN, K)

    # Slot 0 is the positive pair (+score); slots 1..K-1 are negatives (-score),
    # which reproduces `nvectors.neg()` from the reference module.
    signs = jnp.where(
        jax.lax.broadcasted_iota(jnp.int32, (1, K), 1) == 0, 1.0, -1.0
    ).astype(jnp.float32)                         # (1, K)
    z = scores * signs

    # Stable fused log-sigmoid over all K scores at once.
    logsig = jnp.minimum(z, 0.0) - jnp.log(1.0 + jnp.exp(-jnp.abs(z)))   # (TN, K)

    # Mask rows introduced by padding N up to a multiple of the tile size.
    row = pl.program_id(0) * tn + jax.lax.broadcasted_iota(jnp.int32, (tn, 1), 0)
    valid = (row < n_valid).astype(jnp.float32)   # (TN, 1)

    tile_sum = jnp.sum(logsig * valid)            # scalar partial sum for this tile
    out_ref[...] = jnp.full((8, 128), tile_sum, dtype=jnp.float32)


def sgns_loss(ivectors, ovectors, nvectors, batch_size, *, tile_rows=512):
    """-(oloss + nloss).sum() / batch_size, matching SGNS.forward.

    ivectors: (N, E)          gathered input-word vectors
    ovectors: (N, E)          gathered output-word vectors
    nvectors: (N, n_neg, E)   gathered negative-sample vectors (NOT negated)
    """
    N, E = ivectors.shape
    n_neg = nvectors.shape[1]
    K = n_neg + 1

    # Pack each row's positive + negative context vectors into one lane-dense row.
    ctx = jnp.concatenate([ovectors[:, None, :], nvectors], axis=1).reshape(N, K * E)

    tn = _round_up(min(tile_rows, _round_up(N, 8)), 8)
    n_pad = _round_up(N, tn)
    num_tiles = n_pad // tn
    if n_pad != N:
        ivectors = jnp.pad(ivectors, ((0, n_pad - N), (0, 0)))
        ctx = jnp.pad(ctx, ((0, n_pad - N), (0, 0)))

    kernel = functools.partial(sgns_loss_kernel, n_valid=N, n_neg=n_neg, emb_dim=E)

    out = pl.pallas_call(
        kernel,
        out_shape=jax.ShapeDtypeStruct((num_tiles * 8, 128), jnp.float32),
        grid=(num_tiles,),
        in_specs=[
            pl.BlockSpec((tn, E), lambda i: (i, 0)),
            pl.BlockSpec((tn, K * E), lambda i: (i, 0)),
        ],
        out_specs=pl.BlockSpec((8, 128), lambda i: (i, 0)),
        compiler_params=pltpu.CompilerParams(
            dimension_semantics=("parallel",),
            vmem_limit_bytes=32 * 1024 * 1024,
        ),
    )(ivectors, ctx)

    partials = out.reshape(num_tiles, 8, 128)[:, 0, 0]        # one scalar per tile
    return -jnp.sum(partials) / batch_size


def sample_negatives(iword_b, owords_b, V_plus_1, n_negatives):
    # Faithful port of SGNS.sample(); deterministic via random.seed in main.
    nwords_b = []
    for b in range(len(iword_b)):
        iword = iword_b[b]
        owords = owords_b[b]
        nwords = []
        for _ in owords:
            negs = []
            while len(negs) < n_negatives:
                idx = random.randrange(1, V_plus_1)
                if idx == iword or idx in owords or idx in negs:
                    continue
                negs.append(idx)
            nwords.append(negs)
        nwords_b.append(nwords)
    return nwords_b


if __name__ == "__main__":
    # Small, deterministic configuration.
    V = 50                      # vocab size (tables have V+1 rows)
    E = 32                      # embedding dim
    batch_size = 8
    window_size = 4
    n_negatives = 5
    V1 = V + 1
    N = batch_size * window_size

    key = jax.random.PRNGKey(0)
    k_iv, k_ov, k_iw, k_ow = jax.random.split(key, 4)

    # Deterministic "embedding" parameters, stored bf16 (f32 compute in-kernel).
    emb_i = (jax.random.normal(k_iv, (V1, E), dtype=jnp.float32) * 0.1).astype(jnp.bfloat16)
    emb_o = (jax.random.normal(k_ov, (V1, E), dtype=jnp.float32) * 0.1).astype(jnp.bfloat16)

    # Deterministic example inputs (indices in [1, V]).
    iword = jax.random.randint(k_iw, (batch_size,), 1, V1, dtype=jnp.int32)
    owords = jax.random.randint(k_ow, (batch_size, window_size), 1, V1, dtype=jnp.int32)

    # Negative sampling (host-side glue, deterministic seed).
    random.seed(0)
    iword_list = [int(x) for x in iword]
    owords_list = [[int(x) for x in row] for row in owords]
    nwords = sample_negatives(iword_list, owords_list, V1, n_negatives)
    nwords_arr = jnp.asarray(nwords, dtype=jnp.int32)            # (B, W, n_neg)

    # Index construction exactly as in the PyTorch forward:
    #   iword.repeat(1, W).view(-1)  -> whole batch tiled W times
    idx_i = jnp.tile(iword, window_size)                          # (B*W,)
    idx_o = owords.reshape(-1)                                    # (B*W,)
    idx_n = nwords_arr.reshape(N, n_negatives)                    # (B*W, n_neg)

    ivectors = jnp.take(emb_i, idx_i, axis=0)                     # (N, E)      bf16
    ovectors = jnp.take(emb_o, idx_o, axis=0)                     # (N, E)      bf16
    nvectors = jnp.take(emb_o, idx_n.reshape(-1), axis=0).reshape(
        N, n_negatives, E)                                        # (N, n_neg, E), NOT negated

    loss = sgns_loss(ivectors, ovectors, nvectors, batch_size, tile_rows=16)
    loss = jax.block_until_ready(loss)

    # Pure-JAX reference of the original module's math, on the same bf16 data.
    iv_f = ivectors.astype(jnp.float32)
    ov_f = ovectors.astype(jnp.float32)
    nv_f = nvectors.astype(jnp.float32)
    o_ref = jnp.log(jax.nn.sigmoid(jnp.sum(iv_f * ov_f, axis=1)))
    n_ref = jnp.sum(
        jnp.log(jax.nn.sigmoid(jnp.einsum("nje,ne->nj", -nv_f, iv_f))), axis=1)
    ref = -(o_ref + n_ref).sum() / batch_size
    assert jnp.allclose(loss, ref, rtol=1e-4, atol=1e-4), (loss, ref)

    print("KERNEL_OK")
</pallas_src>

<mosaic_0001>
module attributes {stable_mosaic.version = 11 : i64} {
  func.func @sgns_loss_kernel(%arg0: i32, %arg1: memref<16x32xbf16, #tpu.memory_space<vmem>>, %arg2: memref<16x192xbf16, #tpu.memory_space<vmem>>, %arg3: memref<8x128xf32, #tpu.memory_space<vmem>>) attributes {dimension_semantics = [#tpu.dimension_semantics<parallel>], iteration_bounds = array<i64: 2>, scalar_prefetch = 0 : i64, scratch_operands = 0 : i64, tpu.core_type = #tpu.core_type<tc>, window_params = [{transform_indices = @transform_0, window_bounds = array<i64: 16, 32>}, {transform_indices = @transform_1, window_bounds = array<i64: 16, 192>}, {transform_indices = @transform_2, window_bounds = array<i64: 8, 128>}]} {
    %c0 = arith.constant 0 : index
    %c0_0 = arith.constant 0 : index
    %0 = vector.load %arg1[%c0, %c0_0] : memref<16x32xbf16, #tpu.memory_space<vmem>>, vector<16x32xbf16>
    %1 = arith.extf %0 : vector<16x32xbf16> to vector<16x32xf32>
    %c0_1 = arith.constant 0 : index
    %c0_2 = arith.constant 0 : index
    %2 = vector.load %arg2[%c0_1, %c0_2] : memref<16x192xbf16, #tpu.memory_space<vmem>>, vector<16x192xbf16>
    %3 = arith.extf %2 : vector<16x192xbf16> to vector<16x192xf32>
    %4 = tpu.concatenate %1, %1, %1, %1, %1, %1 in 1 : vector<16x32xf32>, vector<16x32xf32>, vector<16x32xf32>, vector<16x32xf32>, vector<16x32xf32>, vector<16x32xf32> -> vector<16x192xf32>
    %5 = arith.mulf %4, %3 : vector<16x192xf32>
    %6 = vector.extract_strided_slice %5 {offsets = [0, 0], sizes = [16, 32], strides = [1, 1]} : vector<16x192xf32> to vector<16x32xf32>
    %cst = arith.constant dense<0.000000e+00> : vector<16xf32>
    %7 = vector.multi_reduction <add>, %6, %cst [1] : vector<16x32xf32> to vector<16xf32>
    %8 = vector.shape_cast %7 : vector<16xf32> to vector<16x1xf32>
    %9 = vector.extract_strided_slice %5 {offsets = [0, 32], sizes = [16, 32], strides = [1, 1]} : vector<16x192xf32> to vector<16x32xf32>
    %cst_3 = arith.constant dense<0.000000e+00> : vector<16xf32>
    %10 = vector.multi_reduction <add>, %9, %cst_3 [1] : vector<16x32xf32> to vector<16xf32>
    %11 = vector.shape_cast %10 : vector<16xf32> to vector<16x1xf32>
    %12 = vector.extract_strided_slice %5 {offsets = [0, 64], sizes = [16, 32], strides = [1, 1]} : vector<16x192xf32> to vector<16x32xf32>
    %cst_4 = arith.constant dense<0.000000e+00> : vector<16xf32>
    %13 = vector.multi_reduction <add>, %12, %cst_4 [1] : vector<16x32xf32> to vector<16xf32>
    %14 = vector.shape_cast %13 : vector<16xf32> to vector<16x1xf32>
    %15 = vector.extract_strided_slice %5 {offsets = [0, 96], sizes = [16, 32], strides = [1, 1]} : vector<16x192xf32> to vector<16x32xf32>
    %cst_5 = arith.constant dense<0.000000e+00> : vector<16xf32>
    %16 = vector.multi_reduction <add>, %15, %cst_5 [1] : vector<16x32xf32> to vector<16xf32>
    %17 = vector.shape_cast %16 : vector<16xf32> to vector<16x1xf32>
    %18 = vector.extract_strided_slice %5 {offsets = [0, 128], sizes = [16, 32], strides = [1, 1]} : vector<16x192xf32> to vector<16x32xf32>
    %cst_6 = arith.constant dense<0.000000e+00> : vector<16xf32>
    %19 = vector.multi_reduction <add>, %18, %cst_6 [1] : vector<16x32xf32> to vector<16xf32>
    %20 = vector.shape_cast %19 : vector<16xf32> to vector<16x1xf32>
    %21 = vector.extract_strided_slice %5 {offsets = [0, 160], sizes = [16, 32], strides = [1, 1]} : vector<16x192xf32> to vector<16x32xf32>
    %cst_7 = arith.constant dense<0.000000e+00> : vector<16xf32>
    %22 = vector.multi_reduction <add>, %21, %cst_7 [1] : vector<16x32xf32> to vector<16xf32>
    %23 = vector.shape_cast %22 : vector<16xf32> to vector<16x1xf32>
    %24 = tpu.concatenate %8, %11, %14, %17, %20, %23 in 1 : vector<16x1xf32>, vector<16x1xf32>, vector<16x1xf32>, vector<16x1xf32>, vector<16x1xf32>, vector<16x1xf32> -> vector<16x6xf32>
    %25 = tpu.iota {dimensions = array<i32: 1>} : vector<1x6xi32>
    %c0_i32 = arith.constant 0 : i32
    %26 = vector.broadcast %c0_i32 : i32 to vector<1x6xi32>
    %27 = arith.cmpi eq, %25, %26 : vector<1x6xi32>
    %cst_8 = arith.constant 1.000000e+00 : f32
    %cst_9 = arith.constant -1.000000e+00 : f32
    %28 = vector.broadcast %cst_8 : f32 to vector<1x6xf32>
    %29 = vector.broadcast %cst_9 : f32 to vector<1x6xf32>
    %30 = arith.select %27, %28, %29 : vector<1x6xi1>, vector<1x6xf32>
    %31 = vector.broadcast %30 : vector<1x6xf32> to vector<16x6xf32>
    %32 = arith.mulf %24, %31 : vector<16x6xf32>
    %cst_10 = arith.constant 0.000000e+00 : f32
    %33 = vector.broadcast %cst_10 : f32 to vector<16x6xf32>
    %34 = arith.minimumf %32, %33 : vector<16x6xf32>
    %35 = math.absf %32 : vector<16x6xf32>
    %cst_11 = arith.constant 0.000000e+00 : f32
    %36 = vector.broadcast %cst_11 : f32 to vector<16x6xf32>
    %37 = arith.subf %36, %35 : vector<16x6xf32>
    %38 = math.exp %37 : vector<16x6xf32>
    %cst_12 = arith.constant 1.000000e+00 : f32
    %39 = vector.broadcast %cst_12 : f32 to vector<16x6xf32>
    %40 = arith.addf %39, %38 : vector<16x6xf32>
    %41 = math.log %40 : vector<16x6xf32>
    %42 = arith.subf %34, %41 : vector<16x6xf32>
    %c16_i32 = arith.constant 16 : i32
    %43 = arith.muli %arg0, %c16_i32 : i32
    %44 = tpu.iota {dimensions = array<i32: 0>} : vector<16x1xi32>
    %45 = vector.broadcast %43 : i32 to vector<16x1xi32>
    %46 = arith.addi %45, %44 : vector<16x1xi32>
    %c32_i32 = arith.constant 32 : i32
    %47 = vector.broadcast %c32_i32 : i32 to vector<16x1xi32>
    %48 = arith.cmpi slt, %46, %47 : vector<16x1xi32>
    %49 = arith.extui %48 : vector<16x1xi1> to vector<16x1xi32>
    %50 = arith.sitofp %49 : vector<16x1xi32> to vector<16x1xf32>
    %51 = vector.broadcast %50 : vector<16x1xf32> to vector<16x6xf32>
    %52 = arith.mulf %42, %51 : vector<16x6xf32>
    %53 = vector.shape_cast %52 : vector<16x6xf32> to vector<1x16x6xf32>
    %cst_13 = arith.constant dense<0.000000e+00> : vector<1xf32>
    %54 = vector.multi_reduction <add>, %53, %cst_13 [1, 2] : vector<1x16x6xf32> to vector<1xf32>
    %55 = vector.shape_cast %54 : vector<1xf32> to vector<1x1x1xf32>
    %56 = vector.extract %55[0, 0, 0] : f32 from vector<1x1x1xf32>
    %57 = vector.broadcast %56 : f32 to vector<8x128xf32>
    %c0_14 = arith.constant 0 : index
    %c0_15 = arith.constant 0 : index
    %58 = vector.load %arg3[%c0_14, %c0_15] : memref<8x128xf32, #tpu.memory_space<vmem>>, vector<8x128xf32>
    tpu.vector_store %arg3[%c0_14, %c0_15], %57 {strides = array<i32>} : memref<8x128xf32, #tpu.memory_space<vmem>>, vector<8x128xf32>,
    return
  }
  func.func @transform_0(%arg0: i32) -> (i32, i32) {
    %c0_i32 = arith.constant 0 : i32
    %c0_i32_0 = arith.constant 0 : i32
    return %arg0, %c0_i32 : i32, i32
  }
  func.func @transform_1(%arg0: i32) -> (i32, i32) {
    %c0_i32 = arith.constant 0 : i32
    %c0_i32_0 = arith.constant 0 : i32
    return %arg0, %c0_i32 : i32, i32
  }
  func.func @transform_2(%arg0: i32) -> (i32, i32) {
    %c0_i32 = arith.constant 0 : i32
    %c0_i32_0 = arith.constant 0 : i32
    return %arg0, %c0_i32 : i32, i32
  }
}

</mosaic_0001>

<bundles_post_ra>
// kernel: tpu_custom_call.1
= control target key start
LH: loop header
LB: loop body
LE: loop exit
PB: predicated region body
PF: predicated region fallthrough
CT: control target
= control target key end

     0   :  { %7 = vsyncpa [#allocation3], 0  ;;  %s964_s0 = inlined_call_operand.hbm [shape: bf16[32,32], index: 0, kind: input, shape index: {}]   ;;  %s965_s1 = inlined_call_operand.hbm [shape: bf16[32,192], index: 1, kind: input, shape index: {}]   ;;  %s966_s2 = inlined_call_operand.hbm [shape: f32[16,128], index: 2, kind: output, shape index: {}]  }
   0x1   :  { %9 = vsyncpa [#allocation3 + $0x1], 0 }
   0x2   :  { %10 = vsyncpa [#allocation6], 0 }
   0x3   :  { %12 = vsyncpa [#allocation6 + $0x1], 0 }
   0x4   :  { %13 = vsyncpa [#allocation4], 0 }
   0x5   :  { %15 = vsyncpa [#allocation4 + $0x1], 0  ;;  %s763_s9 = smov 0   ;;  %s765_s10 = smov 0  }
   0x6   :  { %s767_s11 = smov 0   ;;  %s769_s12 = smov 0  }
   0x7 LB: > { %s784_s13 = sadd.s32 4294967295, %s737_s12   ;;  %s494_s14 = sadd.s32 4294967294, %s737_s12   ;;  %s737_s12 = sphi %s769_s12, %s977_s12   ;;  %s733_s11 = sphi %s767_s11, %s976_s11   ;;  %s729_s10 = sphi %s765_s10, %s975_s10   ;;  %s725_s9 = sphi %s763_s9, %s974_s9  }
   0x8   : > { %s788_s15 = sadd.s32 1, %s737_s12   ;;  %s28_s16 = sadd.s32 1, %s733_s11 }
   0x9   : > { %s25_s17 = ssub.s32 %s737_s12, %s788_s15  ;;  %p35_p0 = scmp.ne.s32.totalorder %s733_s11, %s729_s10 }
   0xa   : > { %p26_p1 = scmp.eq.s32.totalorder %s25_s17, 0  ;;  %p36_p2 = scmp.eq.s32.totalorder %s737_s12, 0 }
   0xb   : > { %p41_p3 = scmp.ne.s32.totalorder %s729_s10, %s725_s9  ;;  %p42_p4 = scmp.eq.s32.totalorder %s784_s13, 0 }
   0xc   : > { %s800_s18 = scalar_select %p26_p1, %s733_s11, %s28_s16  }
   0xd   : > { %p802_p5 = por %p36_p2, %p35_p0  ;;  %p806_p6 = por %p42_p4, %p41_p3 }
   0xe   : > { %p91_p7 = scmp.eq.s32.totalorder %s784_s13, 1  ;;  %p97_p8 = scmp.eq.s32.totalorder %s494_s14, 1 }
   0xf   : > { %p541_p10 = scmp.lt.s32.totalorder %s737_s12, 2  ;;  %s822_s23 = sand.u32 1, %s733_s11  }
  0x10   : > { %p813_p11 = por %p91_p7, %p35_p0  ;;  %p817_p12 = por %p97_p8, %p41_p3 }
  0x11   : > { %s515_s24 = sshll.u32 %s737_s12, 3  ;;  %s497_s25 = sshll.u32 %s822_s23, 3 }
  0x12   : > { %s126_s28 = scalar_lea.hbm %s964_s0, %s515_s24  ;;  %s121_s30 = scalar_lea.vmem [#allocation2], %s497_s25 }
  0x13   : > { %s127_s29 = sshll.u32 %s126_s28, 4  ;;  %s129_s3 = sshll.u32 %s121_s30, 4  ;;  %s128_s29 = int_to_ptr.hbm [resolvable:$true] %s127_s29  ;;  %s130_s3 = int_to_ptr.vmem [resolvable:$true] %s129_s3 }
  0x14   : > { %p831_p13 = pnand %p541_p10, %p802_p5  ;;  %p504_p0 = scmp.ge.s32.totalorder %s737_s12, 1 }
  0x15   : > { %p160_p1 = scmp.lt.s32.totalorder %s737_s12, 3  ;;  %s118_s5 = scalar_lea.sflag [#allocation3], %s822_s23 }
  0x16   : > { %s607_s6 = sshra.s32 %s128_s29, 4  ;;  %p611_p3 = pneg %p831_p13  ;;  %s608_s6 = int_to_ptr.hbm [resolvable:$true] %s607_s6 }
  0x17   : > { %s609_s7 = scalar_lea.hbm %s608_s6, 8  ;;  %s614_s16 = scalar_lea.hbm %s964_s0, 16 }
  0x18   : > { %p610_p2 = scmp.ne.s32.totalorder %s608_s6, %s609_s7  ;;  %p615_p5 = scmp.lt.s32.totalorder %s608_s6, %s964_s0 }
  0x19   : > { %p616_p8 = scmp.lt.s32.totalorder %s614_s16, %s609_s7 }
  0x1a   : > { %p612_p4 = pnand %p611_p3, %p610_p2 }
  0x1b   : > { %p617_p10 = por %p616_p8, %p615_p5 }
  0x1c   : > { %p613_p7 = pneg %p612_p4 }
  0x1e   : > { %p618_p9 = pnand %p617_p10, %p613_p7 }
  0x20   : > { %621 = shalt.err (!%p618_p9)
}
  0x21   : > { %s739_s24 = smov 64   ;;  %s740_s25 = smov 4  }
  0x22   : > { %533 = dma.hbm_to_vmem [thread:$0]  (!%p831_p13), %s128_s29, 128, %s130_s3, %s118_s5, %s739_s24, %s739_s24, %s740_s25  }
  0x23   : > { %p855_p2 = pnand %p504_p0, %p160_p1  ;;  %s500_s27 = sshll.u32 %s822_s23, 4 }
  0x24   : > { %s517_s28 = sshll.u32 %s737_s12, 4  ;;  %s143_s14 = scalar_lea.vmem [#allocation5], %s500_s27 }
  0x25   : > { %s149_s7 = scalar_lea.hbm %s965_s1, %s517_s28  ;;  %s152_s16 = sshll.u32 %s143_s14, 4  ;;  %s153_s16 = int_to_ptr.vmem [resolvable:$true] %s152_s16 }
  0x26   : > { %s150_s8 = sshll.u32 %s149_s7, 4  ;;  %s140_s17 = scalar_lea.sflag [#allocation6], %s822_s23  ;;  %s151_s8 = int_to_ptr.hbm [resolvable:$true] %s150_s8 }
  0x27   : > { %s637_s19 = sshra.s32 %s151_s8, 4  ;;  %s644_s24 = scalar_lea.hbm %s965_s1, 32  ;;  %s638_s19 = int_to_ptr.hbm [resolvable:$true] %s637_s19 }
  0x28   : > { %s639_s29 = scalar_lea.hbm %s638_s19, 16  ;;  %p645_p4 = scmp.lt.s32.totalorder %s638_s19, %s965_s1 }
  0x29   : > { %p640_p9 = scmp.ne.s32.totalorder %s638_s19, %s639_s29  ;;  %p646_p7 = scmp.lt.s32.totalorder %s644_s24, %s639_s29 }
  0x2b   : > { %p642_p0 = pnand %p640_p9, %p611_p3  ;;  %p647_p5 = por %p646_p7, %p645_p4 }
  0x2d   : > { %p643_p1 = pneg %p642_p0 }
  0x2f   : > { %p648_p8 = pnand %p647_p5, %p643_p1 }
  0x31   : > { %651 = shalt.err (!%p648_p8)
}
  0x32   : > { %s741_s23 = smov 128   ;;  %s742_s27 = smov 8  }
  0x33   : > { %536 = dma.hbm_to_vmem [thread:$0]  (!%p831_p13), %s151_s8, 256, %s153_s16, %s140_s17, %s741_s23, %s741_s23, %s742_s27  }
  0x34   : > { %164 = sbr.rel (%p855_p2) target bundleno = 661 (0x295), region = 28  ;;  %s879_s30 = sand.u32 (!%p855_p2), 1, %s729_s10  }
  0x35   : > { %s505_s6 = sshll.u32 (!%p855_p2), %s879_s30, 3  ;;  %s167_s7 = scalar_lea.sflag (!%p855_p2), [#allocation3], %s879_s30 }
  0x36   : > { %s170_s14 = scalar_lea.vmem (!%p855_p2), [#allocation2], %s505_s6 }
  0x39   : > { %712 = dma.done.wait (%p806_p6), %s167_s7, 128  }
  0x3a   : > { %714 = vsyncadd (%p806_p6), %s167_s7, 4294967168  ;;  %s506_s4 = sshll.u32 %s879_s30, 4  ;;  %s177_s26 = scalar_lea.sflag [#allocation6], %s879_s30 }
  0x3b   : > { %s180_s8 = scalar_lea.vmem [#allocation5], %s506_s4 }
  0x3c   : > { %716 = dma.done.wait (%p806_p6), %s177_s26, 256  }
  0x3d   : > { %718 = vsyncadd (%p806_p6), %s177_s26, 4294967040  ;;  %v519_v0 = vld [vmem:[%s170_s14] sm:$0xff]   ;;  %s743_s16 = smov 32   ;;  %s744_s17 = smov 96   ;;  %v213_v5 = vld [vmem:[%s180_s8] sm:$0xff]  ;;  %vm239_vm0 = vcmask 261120   ;;  %v331_v53 = vlaneseq }
  0x3e   : > { %v520_v1 = vunpack.c.l.bf16 %v519_v0  ;;  %v521_v2 = vunpack.c.h.bf16 %v519_v0  ;;  %s745_s19 = smov 64   ;;  %v214_v4 = vld [vmem:[%s180_s8 + $0x8] sm:$0xff]  ;;  %v216_v8 = vunpack.c.h.bf16 %v213_v5  ;;  %vm242_vm1 = vcmask 523264   ;;  %s508_s20 = sshll.u32 %s784_s13, 4 }
  0x3f   : > { %v218_v7 = vunpack.c.h.bf16 %v214_v4  ;;  %v217_v16 = vunpack.c.l.bf16 %v214_v4  ;;  %v215_v20 = vunpack.c.l.bf16 %v213_v5  ;;  %vm245_vm2 = vcmask 785408   ;;  %s512_s29 = sshll.u32 %s784_s13, 3  ;;  %s206_s25 = scalar_lea.vmem [#allocation7], %s505_s6 }
  0x40   : > { %v584_v3 = vpack.i.bf16 %v521_v2, %v520_v1  ;;  %v332_v57 = vand.u32 127, %v331_v53  ;;  %vm316_vm3 = vcmask 7168   ;;  %vm319_vm4 = vcmask 15360   ;;  %s396_s24 = scalar_lea.hbm %s966_s2, %s512_s29  ;;  %s398_s28 = sshll.u32 %s206_s25, 4  ;;  %s399_s28 = int_to_ptr.vmem [resolvable:$true] %s398_s28 }
  0x41   : > { %vm325_vm6 = vcmask 31744   ;;  %vm322_vm7 = vcmask 23552   ;;  %vm328_vm8 = vcmask 39936   ;;  %v746_v63 = vmov -1.0   ;;  %s400_s23 = sshll.u32 %s396_s24, 4  ;;  %s386_s7 = scalar_lea.sflag [#allocation4], %s879_s30  ;;  %s401_s23 = int_to_ptr.hbm [resolvable:$true] %s400_s23 }
  0x42   : > { %585 = vrot.lane.b32.xlu0 %v584_v3, %s743_s16  ;;  %595 = vrot.lane.b32.xlu1 %v584_v3, %s744_s17  ;;  %vm333_vm5 = vcmp.eq.s32.totalorder %v332_v57, 0  ;;  %vm370_vm11 = vcmask 48128   ;;  %s681_s14 = sshra.s32 %s401_s23, 4  ;;  %s687_s8 = scalar_lea.hbm %s966_s2, 16  ;;  %s682_s14 = int_to_ptr.hbm [resolvable:$true] %s681_s14 }
  0x43   : > { %v334_v0 = vsel %vm333_vm5, 1.0, %v746_v63  ;;  %s683_s4 = scalar_lea.hbm %s682_s14, 8  ;;  %p688_p10 = scmp.lt.s32.totalorder %s682_s14, %s966_s2 }
  0x44   : > { %p684_p6 = scmp.ne.s32.totalorder %s682_s14, %s683_s4  ;;  %p689_p2 = scmp.lt.s32.totalorder %s687_s8, %s683_s4 }
  0x46   : > { %p685_p13 = pnand %p684_p6, %p813_p11  ;;  %p690_p9 = por %p689_p2, %p688_p10 }
  0x48   : > { %p686_p3 = pneg %p685_p13 }
  0x4a   : > { %590 = vrot.lane.b32.xlu0 %v584_v3, %s745_s19  ;;  %p691_p0 = pnand %p690_p9, %p686_p3 }
  0xb4   : > { %v586_v6 = vpop.permute.xlu0 %585  ;;  %v596_v15 = vpop.permute.xlu1 %595 }
  0xb5   : > { %v588_v9 = vunpack.i.h.bf16 %v586_v6  ;;  %v587_v10 = vunpack.i.l.bf16 %v586_v6  ;;  %v598_v18 = vunpack.i.h.bf16 %v596_v15  ;;  %v597_v19 = vunpack.i.l.bf16 %v596_v15 }
  0xb7   : > { %v241_v11 = vsel %vm239_vm0, %v521_v2, %v588_v9  ;;  %v240_v12 = vsel %vm239_vm0, %v520_v1, %v587_v10 }
  0xb8   : > { %v251_v13 = vmul.f32 %v241_v11, %v218_v7  ;;  %v249_v14 = vmul.f32 %v240_v12, %v216_v8 }
  0xba   : > { %306 = vrot.lane.b32.xlu1 %v251_v13, %s744_s17  ;;  %304 = vrot.lane.b32.xlu0 %v249_v14, %s744_s17  ;;  %v296_v29 = vsel %vm239_vm0, %v249_v14, 0.0  ;;  %v299_v48 = vsel %vm239_vm0, %v251_v13, 0.0 }
  0xbc   : > { %v591_v17 = vpop.permute.xlu0 %590 }
  0xbd   : > { %v593_v21 = vunpack.i.h.bf16 %v591_v17  ;;  %v592_v22 = vunpack.i.l.bf16 %v591_v17 }
  0xbf   : > { %v243_v23 = vsel %vm242_vm1, %v240_v12, %v592_v22  ;;  %v244_v24 = vsel %vm242_vm1, %v241_v11, %v593_v21  ;;  %v357_v21 = vshrl.u32 %v331_v53, 7  ;;  %v359_v22 = vstv %s508_s20 }
  0xc0   : > { %v246_v25 = vsel %vm245_vm2, %v243_v23, %v597_v19  ;;  %v247_v26 = vsel %vm245_vm2, %v244_v24, %v598_v18 }
  0xc1   : > { %v248_v27 = vmul.f32 %v246_v25, %v215_v20  ;;  %v250_v28 = vmul.f32 %v247_v26, %v217_v16  ;;  %v358_v24 = vadd.s32 8, %v357_v21 }
  0xc3   : > { %262 = vrot.lane.b32.xlu2 %v250_v28, %s744_s17  ;;  %274 = vrot.lane.b32.xlu0 %v250_v28, %s745_s19  ;;  %v255_v30 = vsel %vm239_vm0, %v250_v28, 0.0  ;;  %v252_v31 = vsel %vm239_vm0, %v248_v27, 0.0 }
  0xc4   : > { %260 = vrot.lane.b32.xlu1 %v248_v27, %s744_s17 }
  0xcb   : > { %272 = vrot.lane.b32.xlu2 %v248_v27, %s745_s19 }
  0xcc   : > { %284 = vrot.lane.b32.xlu1 %v248_v27, %s743_s16  ;;  %v360_v27 = vadd.s32 %v359_v22, %v357_v21 }
  0xce   : > { %vm362_vm9 = vcmp.lt.s32.totalorder %v360_v27, 32 }
  0xd3   : > { %286 = vrot.lane.b32.xlu2 %v250_v28, %s743_s16 }
  0xed   : > { %297 = vadd.xlane.f32.xlu0 %v296_v29  ;;  %v361_v29 = vadd.s32 %v359_v22, %v358_v24 }
  0xef   : > { %vm363_vm10 = vcmp.lt.s32.totalorder %v361_v29, 32 }
  0xf5   : > { %256 = vadd.xlane.f32.xlu0 %v255_v30 }
  0xfc   : > { %253 = vadd.xlane.f32.xlu2 %v252_v31 }
 0x11d   : > { %v263_v32 = vpop.permute.xlu2 %262 }
 0x11e   : > { %v269_v33 = vsel %vm239_vm0, %v263_v32, 0.0 }
 0x11f   : > { %270 = vadd.xlane.f32.xlu2 %v269_v33  ;;  %v747_v33 = vmov 0.0  }
 0x125   : > { %v273_v34 = vpop.permute.xlu2 %272 }
 0x126   : > { %v278_v35 = vsel %vm239_vm0, %v273_v34, 0.0  ;;  %v509_v34 = vsel %vm362_vm9, 1.0, %v747_v33 }
 0x127   : > { %279 = vadd.xlane.f32.xlu2 %v278_v35 }
 0x12c   : > { %v307_v36 = vpop.permute.xlu1 %306  ;;  %v305_v37 = vpop.permute.xlu0 %304 }
 0x12d   : > { %v287_v38 = vpop.permute.xlu2 %286  ;;  %v310_v43 = vsel %vm239_vm0, %v305_v37, 0.0  ;;  %v313_v46 = vsel %vm239_vm0, %v307_v36, 0.0  ;;  %v510_v37 = vsel %vm363_vm10, 1.0, %v747_v33 }
 0x12e   : > { %v293_v39 = vsel %vm239_vm0, %v287_v38, 0.0 }
 0x12f   : > { %294 = vadd.xlane.f32.xlu2 %v293_v39 }
 0x135   : > { %v275_v40 = vpop.permute.xlu0 %274 }
 0x136   : > { %v261_v41 = vpop.permute.xlu1 %260  ;;  %v281_v42 = vsel %vm239_vm0, %v275_v40, 0.0 }
 0x137   : > { %282 = vadd.xlane.f32.xlu0 %v281_v42  ;;  %v266_v44 = vsel %vm239_vm0, %v261_v41, 0.0  ;;  %311 = vadd.xlane.f32.xlu2 %v310_v43 }
 0x138   : > { %267 = vadd.xlane.f32.xlu1 %v266_v44 }
 0x13e   : > { %v285_v45 = vpop.permute.xlu1 %284 }
 0x13f   : > { %314 = vadd.xlane.f32.xlu0 %v313_v46  ;;  %v290_v47 = vsel %vm239_vm0, %v285_v45, 0.0 }
 0x140   : > { %291 = vadd.xlane.f32.xlu1 %v290_v47 }
 0x148   : > { %300 = vadd.xlane.f32.xlu1 %v299_v48 }
 0x160   : > { %v298_v51 = vpop.xlane.xlu0 %297 }
 0x168   : > { %v257_v54 = vpop.xlane.xlu0 %256 }
 0x16f   : > { %v254_v49 = vpop.xlane.xlu2 %253 }
 0x192   : > { %v271_v50 = vpop.xlane.xlu2 %270 }
 0x193   : > { %v318_v4 = vsel %vm316_vm3, %v257_v54, %v271_v50 }
 0x19a   : > { %v280_v52 = vpop.xlane.xlu2 %279 }
 0x1a2   : > { %v295_v55 = vpop.xlane.xlu2 %294 }
 0x1aa   : > { %v283_v59 = vpop.xlane.xlu0 %282  ;;  %v312_v1 = vpop.xlane.xlu2 %311 }
 0x1ab   : > { %v268_v56 = vpop.xlane.xlu1 %267  ;;  %v321_v6 = vsel %vm319_vm4, %v318_v4, %v283_v59 }
 0x1ac   : > { %v317_v58 = vsel %vm316_vm3, %v254_v49, %v268_v56  ;;  %v324_v9 = vsel %vm322_vm7, %v321_v6, %v295_v55 }
 0x1ad   : > { %v320_v61 = vsel %vm319_vm4, %v317_v58, %v280_v52 }
 0x1b2   : > { %v315_v11 = vpop.xlane.xlu0 %314 }
 0x1b3   : > { %v292_v60 = vpop.xlane.xlu1 %291 }
 0x1b4   : > { %v323_v62 = vsel %vm322_vm7, %v320_v61, %v292_v60 }
 0x1b5   : > { %v326_v2 = vsel %vm325_vm6, %v323_v62, %v298_v51 }
 0x1b6   : > { %v329_v3 = vsel %vm328_vm8, %v326_v2, %v312_v1 }
 0x1b7   : > { %v335_v5 = vmul.f32 %v334_v0, %v329_v3 }
 0x1b9   : > { %v339_v7 = vand.u32 2147483647, %v335_v5  ;;  %v337_v30 = vmin.f32 %v335_v5, 0.0 }
 0x1bb   : > { %v301_v8 = vpop.xlane.xlu1 %300  ;;  %v341_v10 = vsub.f32 0.0, %v339_v7 }
 0x1bc   : > { %v327_v12 = vsel %vm325_vm6, %v324_v9, %v301_v8 }
 0x1bd   : > { %v330_v13 = vsel %vm328_vm8, %v327_v12, %v315_v11  ;;  %v343_v14 = vmul.f32 1.442695, %v341_v10 }
 0x1be   : > { %v336_v15 = vmul.f32 %v334_v0, %v330_v13 }
 0x1bf   : > { %599 = vpow2.f32 %v343_v14 }
 0x1c0   : > { %v340_v16 = vand.u32 2147483647, %v336_v15  ;;  %v338_v35 = vmin.f32 %v336_v15, 0.0 }
 0x1c2   : > { %v342_v17 = vsub.f32 0.0, %v340_v16 }
 0x1c4   : > { %v345_v18 = vmul.f32 1.442695, %v342_v17 }
 0x1c5   : > { %v600_v19 = vpop.eup %599 }
 0x1c6   : > { %601 = vpow2.f32 %v345_v18  ;;  %v347_v20 = vadd.f32 1.0, %v600_v19 }
 0x1c8   : > { %603 = vlog2.f32 %v347_v20 }
 0x1cc   : > { %v602_v23 = vpop.eup %601 }
 0x1cd   : > { %v348_v25 = vadd.f32 1.0, %v602_v23 }
 0x1ce   : > { %v604_v26 = vpop.eup %603 }
 0x1cf   : > { %605 = vlog2.f32 %v348_v25  ;;  %v350_v28 = vmul.f32 0.6931472, %v604_v26 }
 0x1d1   : > { %v353_v31 = vsub.f32 %v337_v30, %v350_v28 }
 0x1d3   : > { %v368_v39 = vmul.f32 %v509_v34, %v353_v31 }
 0x1d5   : > { %v606_v32 = vpop.eup %605  ;;  %v371_v41 = vsel %vm370_vm11, %v368_v39, 0.0 }
 0x1d6   : > { %v352_v36 = vmul.f32 0.6931472, %v606_v32 }
 0x1d8   : > { %v354_v38 = vsub.f32 %v338_v35, %v352_v36 }
 0x1da   : > { %v369_v40 = vmul.f32 %v510_v37, %v354_v38 }
 0x1dc   : > { %v372_v42 = vsel %vm370_vm11, %v369_v40, 0.0 }
 0x1dd   : > { %v373_v43 = vadd.f32 %v372_v42, %v371_v41 }
 0x1df   : > { %374 = vadd.xlane.f32.xlu1 %v373_v43 }
 0x252   : > { %v375_v44 = vpop.xlane.xlu1 %374 }
 0x253   : > { %v376_v45 = vrot.slane %v375_v44, 4 }
 0x255   : > { %v377_v46 = vadd.f32 %v376_v45, %v375_v44 }
 0x257   : > { %v378_v47 = vrot.slane %v377_v46, 2 }
 0x259   : > { %v379_v48 = vadd.f32 %v378_v47, %v377_v46 }
 0x25b   : > { %v380_v49 = vrot.slane %v379_v48, 1 }
 0x25d   : > { %v381_v50 = vadd.f32 %v380_v49, %v379_v48 }
 0x25f   : > { %522 = vpush %v381_v50 }
 0x290   : > { %s523_s27 = spop %522 }
 0x291   : > { %v383_v51 = vstv %s523_s27 }
 0x292   : > { %384 = vst [vmem:[%s206_s25] sm:$0xff] %v383_v51 }
 0x293   : > { %694 = shalt.err (!%p691_p0)
}
 0x294   : > { %528 = dma.vmem_to_hbm [thread:$0]  (%p813_p11), %s399_s28, 128, %s401_s23, %s386_s7  }
 0x295 PF: > { %s412_s30 = sand.u32 1, %s725_s9   ;;  %p973_p1 = scmp.ge.s32.totalorder %s737_s12, 2 }
 0x296   : > { %s413_s17 = scalar_lea.sflag [#allocation4], %s412_s30 }
 0x297   : > { %p538_p4 = pnand %p973_p1, %p817_p12 }
 0x299   : > { %p539_p7 = pneg %p538_p4 }
 0x29b   : > { %720 = dma.done.wait (%p539_p7), %s413_s17, 128  }
 0x29c   : > { %722 = vsyncadd (%p539_p7), %s413_s17, 4294967168  ;;  %p18_p5 = scmp.ge.s32.totalorder %s788_s15, 4   ;;  %s974_s9 = smov %s729_s10 }
 0x29d   : > { %s975_s10 = smov %s733_s11  ;;  %s976_s11 = smov %s800_s18 }
 0x29e   : > { %s977_s12 = smov %s788_s15  ;;  %20 = sbr.rel (!%p18_p5) target bundleno = 7 (0x7), region = 86 }
 0x2a3   :  { %419 = vsyncpa [#allocation3], 1 }
 0x2a4   :  { %421 = vsyncpa [#allocation3 + $0x1], 1 }
 0x2a5   :  { %422 = vsyncpa [#allocation6], 1 }
 0x2a6   :  { %424 = vsyncpa [#allocation6 + $0x1], 1 }
 0x2a7   :  { %425 = vsyncpa [#allocation4], 1 }
 0x2a8   :  { %427 = vsyncpa [#allocation4 + $0x1], 1 }

</bundles_post_ra>
